<compile_context>
chip_gen: v6e
topology: v6e:2x2x1
jax: 0.10.0
libtpu: 0.0.40
codegen_flags: <defaults>
</compile_context>

<pallas_src>
import functools
import math

import numpy as np
import jax
import jax.numpy as jnp
from jax import lax
from jax.experimental import pallas as pl
from jax.experimental.pallas import tpu as pltpu


def _round_up(v, m):
    return ((v + m - 1) // m) * m


def _spherical_conv_transpose_kernel(idx_ref, x_ref, w_ref, o_ref, acc_ref, *,
                                     n_pad, out_pad, tile_n, eps):
    """Grid point = (batch b, neighbour slot i, point tile nt)."""
    i = pl.program_id(1)
    nt = pl.program_id(2)

    @pl.when((i == 0) & (nt == 0))
    def _init():
        acc_ref[...] = jnp.zeros_like(acc_ref)

    C = x_ref.shape[1]
    M = max(n_pad, out_pad)

    idx = idx_ref[0, 0]                          # (1, TN) int32 neighbour ids
    w = w_ref[...]                               # (O, C+1) f32, pre-scaled by 1/k

    # Single bf16 one-hot per tile, shared by gather (rows < n_pad) and
    # scatter (rows < out_pad).  0/1 values are exact in bf16; idx == -1
    # (padding) gives an all-zero column and contributes nothing.
    rows = lax.broadcasted_iota(jnp.int32, (M, tile_n), 0)
    oh = (rows == idx).astype(jnp.bfloat16)      # (M, TN)
    oh_g = oh[:n_pad]                            # (N_p, TN)

    # Gather neighbour features knn[c, j] = x[c, idx[j]] on the bf16 MXU.
    # TODO(synk): original torch.gather(x, 2, idx4d) is an ndim mismatch; the
    # intended neighbour gather is implemented here.  x is split into two bf16
    # halves so the gathered values stay f32-accurate on the bf16 MXU path.
    x_f = x_ref[0].astype(jnp.float32)           # (C, N_p)
    x_hi = x_f.astype(jnp.bfloat16)
    knn = jnp.dot(x_hi, oh_g, preferred_element_type=jnp.float32)     # (C, TN)
    if x_ref.dtype != jnp.bfloat16:
        x_lo = (x_f - x_hi.astype(jnp.float32)).astype(jnp.bfloat16)
        knn = knn + jnp.dot(x_lo, oh_g, preferred_element_type=jnp.float32)

    # Centre features of this tile: a contiguous slice of x (no broadcast one-hot).
    start = pl.multiple_of(nt * tile_n, tile_n)
    x_c = x_ref[0, :, pl.ds(start, tile_n)].astype(jnp.float32)       # (C, TN)

    # Local frame (diff, ||diff||), L2-normalised: ||(diff, ||diff||)|| = sqrt(2*sq).
    diff = knn - x_c                                                  # (C, TN)
    sq = jnp.sum(diff * diff, axis=0, keepdims=True)                  # (1, TN)
    inv = lax.rsqrt(2.0 * sq + eps)                                   # EUP rsqrt
    frame_d = diff * inv                                              # (C, TN)
    frame_n = jnp.sqrt(sq) * inv                                      # (1, TN)

    # TODO(synk): original `weights * frame` broadcast is shape-inconsistent; the
    # intended contraction (sum_c weight[o,c,:]) . frame is used (needs ks == C+1).
    dot = (jnp.dot(w[:, :C], frame_d, preferred_element_type=jnp.float32)
           + w[:, C:C + 1] * frame_n)                                 # (O, TN)

    # TODO(synk): original advanced-index `+=` is a non-accumulating cross-batch
    # scatter; the intended per-batch scatter-add is done with the bf16 one-hot,
    # accumulating in f32.
    contrib = lax.dot_general(dot.astype(jnp.bfloat16), oh[:out_pad],
                              dimension_numbers=(((1,), (1,)), ((), ())),
                              preferred_element_type=jnp.float32)     # (O, out_p)
    acc_ref[...] += contrib

    @pl.when((i == pl.num_programs(1) - 1) & (nt == pl.num_programs(2) - 1))
    def _store():
        o_ref[0] = acc_ref[...].astype(o_ref.dtype)


def spherical_conv_transpose(x, adj, weight, output_size, *, tile_n=512):
    B, C, N = x.shape
    k = adj.shape[-1]
    K = k - 1
    out_n, out_c = output_size
    O, Cw, ks = weight.shape
    assert Cw == C
    assert out_c == O
    assert ks == C + 1, "kernel_size must equal in_channels + 1 (frame dimension)"
    assert tile_n % 128 == 0

    TN = min(tile_n, _round_up(N, 128))      # lanes per grid step (multiple of 128)
    N_p = _round_up(N, TN)
    out_p = _round_up(out_n, 128)            # lane-dense output stores
    NT = N_p // TN

    # Pad points (zeros for x, -1 for indices so padding contributes nothing) and
    # store neighbour indices neighbour-major: idx[b, i, 0, n] = adj[b, n, 1 + i].
    x_p = jnp.pad(x, ((0, 0), (0, 0), (0, N_p - N)))
    idx = jnp.transpose(adj[:, :, 1:], (0, 2, 1)).astype(jnp.int32)       # (B, K, N)
    idx = jnp.pad(idx, ((0, 0), (0, 0), (0, N_p - N)), constant_values=-1)
    idx = idx.reshape(B, K, 1, N_p)

    # Fold the channel-sum of the weights and the 1/k normalisation in on the host.
    wsum = (jnp.sum(weight, axis=1) / k).astype(jnp.float32)              # (O, C+1)

    kernel = functools.partial(_spherical_conv_transpose_kernel,
                               n_pad=N_p, out_pad=out_p, tile_n=TN, eps=1e-12)

    out = pl.pallas_call(
        kernel,
        out_shape=jax.ShapeDtypeStruct((B, O, out_p), x.dtype),
        grid_spec=pltpu.PrefetchScalarGridSpec(
            num_scalar_prefetch=0,
            grid=(B, K, NT),
            in_specs=[
                pl.BlockSpec((1, 1, 1, TN), lambda b, i, nt: (b, i, 0, nt)),
                pl.BlockSpec((1, C, N_p), lambda b, i, nt: (b, 0, 0)),
                pl.BlockSpec((O, ks), lambda b, i, nt: (0, 0)),
            ],
            out_specs=pl.BlockSpec((1, O, out_p), lambda b, i, nt: (b, 0, 0)),
            scratch_shapes=[pltpu.VMEM((O, out_p), jnp.float32)],
        ),
        compiler_params=pltpu.CompilerParams(
            dimension_semantics=("parallel", "arbitrary", "arbitrary"),
            vmem_limit_bytes=32 * 1024 * 1024,
        ),
    )(idx, x_p, wsum)

    return out[:, :, :out_n]


def reference_forward(x, adj, weight, output_size):
    """Pure-JAX (f32) reference of the same (intended) semantics."""
    B, C, N = x.shape
    k = adj.shape[-1]
    out_n, _ = output_size
    knn_idx = adj[:, :, 1:]                                           # (B, N, K)
    knn = jax.vmap(lambda xb, ib: xb[:, ib])(x, knn_idx)              # (B, C, N, K)
    diff = knn - x[:, :, :, None]
    nrm = jnp.sqrt(jnp.sum(diff * diff, axis=1, keepdims=True))       # (B, 1, N, K)
    frame = jnp.concatenate([diff, nrm], axis=1)                      # (B, C+1, N, K)
    frame = frame / jnp.sqrt(jnp.sum(frame * frame, axis=1, keepdims=True))
    wsum = jnp.sum(weight, axis=1)                                    # (O, C+1)
    dot = jnp.einsum("oj,bjnk->bonk", wsum, frame)                    # (B, O, N, K)
    onehot = (knn_idx[..., None] == jnp.arange(out_n)).astype(x.dtype)  # (B,N,K,outN)
    out = jnp.einsum("bonk,bnkm->bom", dot, onehot) / k
    return out


if __name__ == "__main__":
    B, C, N, k = 2, 4, 200, 8
    O = 8
    ks = C + 1                      # kernel_size == in_channels + 1
    out_n = 300                     # upsampled point count (transpose conv)
    output_size = (out_n, O)

    key = jax.random.PRNGKey(0)
    kx, ka, kw = jax.random.split(key, 3)

    x = jax.random.normal(kx, (B, C, N), dtype=jnp.float32)

    # Adjacency: column 0 = self, columns 1..k-1 = random neighbours != self.
    self_idx = jnp.broadcast_to(
        jnp.arange(N, dtype=jnp.int32)[None, :, None], (B, N, 1))
    offs = jax.random.randint(ka, (B, N, k - 1), 1, N, dtype=jnp.int32)
    neigh = (self_idx + offs) % N
    adj = jnp.concatenate([self_idx, neigh], axis=-1)                 # (B, N, k)

    # kaiming_uniform_(a=sqrt(5)) on (O, C, ks): bound = 1/sqrt(fan_in), fan_in=C*ks.
    fan_in = C * ks
    bound = 1.0 / math.sqrt(fan_in)
    weight = jax.random.uniform(kw, (O, C, ks), minval=-bound, maxval=bound,
                                dtype=jnp.float32)

    # tile_n=128 so this small run exercises the multi-tile reduction path (NT=2).
    out = spherical_conv_transpose(x, adj, weight, output_size, tile_n=128)
    out = jax.block_until_ready(out)
    assert out.shape == (B, O, out_n)

    ref = reference_forward(x, adj, weight, output_size)
    # bf16 MXU operands (one-hot + per-neighbour dot) -> modestly relaxed tolerance.
    np.testing.assert_allclose(np.asarray(out), np.asarray(ref),
                               rtol=1e-2, atol=5e-3)
    print("KERNEL_OK")
</pallas_src>

<mosaic_0001>
module attributes {stable_mosaic.version = 11 : i64} {
  func.func @_spherical_conv_transpose_kernel(%arg0: i32, %arg1: i32, %arg2: i32, %arg3: memref<1x1x1x128xi32, #tpu.memory_space<vmem>>, %arg4: memref<1x4x256xf32, #tpu.memory_space<vmem>>, %arg5: memref<8x5xf32, #tpu.memory_space<vmem>>, %arg6: memref<1x8x384xf32, #tpu.memory_space<vmem>>, %arg7: memref<8x384xf32, #tpu.memory_space<vmem>>) attributes {dimension_semantics = [#tpu.dimension_semantics<parallel>, #tpu.dimension_semantics<arbitrary>, #tpu.dimension_semantics<arbitrary>], iteration_bounds = array<i64: 2, 7, 2>, scalar_prefetch = 0 : i64, scratch_operands = 1 : i64, tpu.core_type = #tpu.core_type<tc>, window_params = [{transform_indices = @transform_0, window_bounds = array<i64: 1, 1, 1, 128>}, {transform_indices = @transform_1, window_bounds = array<i64: 1, 4, 256>}, {pipeline_mode = #tpu.pipeline_mode<synchronous>, transform_indices = @transform_2, window_bounds = array<i64: 8, 5>}, {transform_indices = @transform_3, window_bounds = array<i64: 1, 8, 384>}]} {
    %c0_i32 = arith.constant 0 : i32
    %0 = arith.cmpi eq, %arg1, %c0_i32 : i32
    %c0_i32_0 = arith.constant 0 : i32
    %1 = arith.cmpi eq, %arg2, %c0_i32_0 : i32
    %2 = arith.andi %0, %1 : i1
    %3 = arith.extui %2 : i1 to i32
    %c0_i32_1 = arith.constant 0 : i32
    %4 = arith.cmpi ne, %3, %c0_i32_1 : i32
    scf.if %4 {
      %cst_23 = arith.constant 0.000000e+00 : f32
      %59 = vector.broadcast %cst_23 : f32 to vector<8x384xf32>
      %c0_24 = arith.constant 0 : index
      %c0_25 = arith.constant 0 : index
      %60 = vector.load %arg7[%c0_24, %c0_25] : memref<8x384xf32, #tpu.memory_space<vmem>>, vector<8x384xf32>
      tpu.vector_store %arg7[%c0_24, %c0_25], %59 {strides = array<i32>} : memref<8x384xf32, #tpu.memory_space<vmem>>, vector<8x384xf32>,
    } else {
    }
    %c0 = arith.constant 0 : index
    %c0_2 = arith.constant 0 : index
    %c0_3 = arith.constant 0 : index
    %c0_4 = arith.constant 0 : index
    %5 = vector.load %arg3[%c0, %c0_2, %c0_3, %c0_4] : memref<1x1x1x128xi32, #tpu.memory_space<vmem>>, vector<1x1x1x128xi32>
    %6 = vector.shape_cast %5 : vector<1x1x1x128xi32> to vector<1x128xi32>
    %c0_5 = arith.constant 0 : index
    %c0_6 = arith.constant 0 : index
    %7 = vector.load %arg5[%c0_5, %c0_6] : memref<8x5xf32, #tpu.memory_space<vmem>>, vector<8x5xf32>
    %8 = tpu.iota {dimensions = array<i32: 0>} : vector<384x128xi32>
    %9 = vector.broadcast %6 : vector<1x128xi32> to vector<384x128xi32>
    %10 = arith.cmpi eq, %8, %9 : vector<384x128xi32>
    %11 = arith.extui %10 : vector<384x128xi1> to vector<384x128xi32>
    %12 = arith.sitofp %11 : vector<384x128xi32> to vector<384x128xf32>
    %13 = arith.truncf %12 : vector<384x128xf32> to vector<384x128xbf16>
    %14 = vector.extract_strided_slice %13 {offsets = [0, 0], sizes = [256, 128], strides = [1, 1]} : vector<384x128xbf16> to vector<256x128xbf16>
    %c0_7 = arith.constant 0 : index
    %c0_8 = arith.constant 0 : index
    %c0_9 = arith.constant 0 : index
    %15 = vector.load %arg4[%c0_7, %c0_8, %c0_9] : memref<1x4x256xf32, #tpu.memory_space<vmem>>, vector<1x4x256xf32>
    %16 = vector.shape_cast %15 : vector<1x4x256xf32> to vector<4x256xf32>
    %17 = arith.truncf %16 : vector<4x256xf32> to vector<4x256xbf16>
    %cst = arith.constant dense<0.000000e+00> : vector<4x128xf32>
    %18 = tpu.matmul %17, %14, %cst {dimension_numbers = #tpu.dot_dimension_numbers<[1], [0], [0], [1], [0, 0, 1, 1], [], []>} : vector<4x256xbf16>, vector<256x128xbf16>, vector<4x128xf32> -> vector<4x128xf32>
    %19 = arith.extf %17 : vector<4x256xbf16> to vector<4x256xf32>
    %20 = arith.subf %16, %19 : vector<4x256xf32>
    %21 = arith.truncf %20 : vector<4x256xf32> to vector<4x256xbf16>
    %cst_10 = arith.constant dense<0.000000e+00> : vector<4x128xf32>
    %22 = tpu.matmul %21, %14, %cst_10 {dimension_numbers = #tpu.dot_dimension_numbers<[1], [0], [0], [1], [0, 0, 1, 1], [], []>} : vector<4x256xbf16>, vector<256x128xbf16>, vector<4x128xf32> -> vector<4x128xf32>
    %23 = arith.addf %18, %22 : vector<4x128xf32>
    %c128_i32 = arith.constant 128 : i32
    %24 = arith.muli %arg2, %c128_i32 : i32
    %25 = tpu.assume_multiple %24, 128 : i32
    %c0_11 = arith.constant 0 : index
    %c0_12 = arith.constant 0 : index
    %26 = arith.index_cast %25 : i32 to index
    %27 = vector.load %arg4[%c0_11, %c0_12, %26] : memref<1x4x256xf32, #tpu.memory_space<vmem>>, vector<1x4x128xf32>
    %28 = vector.shape_cast %27 : vector<1x4x128xf32> to vector<4x128xf32>
    %29 = arith.subf %23, %28 : vector<4x128xf32>
    %30 = arith.mulf %29, %29 : vector<4x128xf32>
    %cst_13 = arith.constant dense<0.000000e+00> : vector<128xf32>
    %31 = vector.multi_reduction <add>, %30, %cst_13 [0] : vector<4x128xf32> to vector<128xf32>
    %32 = vector.shape_cast %31 : vector<128xf32> to vector<1x128xf32>
    %cst_14 = arith.constant 2.000000e+00 : f32
    %33 = vector.broadcast %cst_14 : f32 to vector<1x128xf32>
    %34 = arith.mulf %33, %32 : vector<1x128xf32>
    %cst_15 = arith.constant 9.99999996E-13 : f32
    %35 = vector.broadcast %cst_15 : f32 to vector<1x128xf32>
    %36 = arith.addf %34, %35 : vector<1x128xf32>
    %37 = math.rsqrt %36 : vector<1x128xf32>
    %38 = vector.broadcast %37 : vector<1x128xf32> to vector<4x128xf32>
    %39 = arith.mulf %29, %38 : vector<4x128xf32>
    %40 = math.sqrt %32 : vector<1x128xf32>
    %41 = arith.mulf %40, %37 : vector<1x128xf32>
    %42 = vector.extract_strided_slice %7 {offsets = [0, 0], sizes = [8, 4], strides = [1, 1]} : vector<8x5xf32> to vector<8x4xf32>
    %cst_16 = arith.constant dense<0.000000e+00> : vector<8x128xf32>
    %43 = tpu.matmul %42, %39, %cst_16 {dimension_numbers = #tpu.dot_dimension_numbers<[1], [0], [0], [1], [0, 0, 1, 1], [], []>} : vector<8x4xf32>, vector<4x128xf32>, vector<8x128xf32> -> vector<8x128xf32>
    %44 = vector.extract_strided_slice %7 {offsets = [0, 4], sizes = [8, 1], strides = [1, 1]} : vector<8x5xf32> to vector<8x1xf32>
    %45 = vector.broadcast %44 : vector<8x1xf32> to vector<8x128xf32>
    %46 = vector.broadcast %41 : vector<1x128xf32> to vector<8x128xf32>
    %47 = arith.mulf %45, %46 : vector<8x128xf32>
    %48 = arith.addf %43, %47 : vector<8x128xf32>
    %49 = arith.truncf %48 : vector<8x128xf32> to vector<8x128xbf16>
    %cst_17 = arith.constant dense<0.000000e+00> : vector<8x384xf32>
    %50 = tpu.matmul %49, %13, %cst_17 {dimension_numbers = #tpu.dot_dimension_numbers<[1], [1], [0], [0], [0, 0, 1, 0], [], []>} : vector<8x128xbf16>, vector<384x128xbf16>, vector<8x384xf32> -> vector<8x384xf32>
    %c0_18 = arith.constant 0 : index
    %c0_19 = arith.constant 0 : index
    %51 = vector.load %arg7[%c0_18, %c0_19] : memref<8x384xf32, #tpu.memory_space<vmem>>, vector<8x384xf32>
    %52 = arith.addf %51, %50 : vector<8x384xf32>
    %c0_20 = arith.constant 0 : index
    %c0_21 = arith.constant 0 : index
    %53 = vector.load %arg7[%c0_20, %c0_21] : memref<8x384xf32, #tpu.memory_space<vmem>>, vector<8x384xf32>
    tpu.vector_store %arg7[%c0_20, %c0_21], %52 {strides = array<i32>} : memref<8x384xf32, #tpu.memory_space<vmem>>, vector<8x384xf32>,
    %c6_i32 = arith.constant 6 : i32
    %54 = arith.cmpi eq, %arg1, %c6_i32 : i32
    %c1_i32 = arith.constant 1 : i32
    %55 = arith.cmpi eq, %arg2, %c1_i32 : i32
    %56 = arith.andi %54, %55 : i1
    %57 = arith.extui %56 : i1 to i32
    %c0_i32_22 = arith.constant 0 : i32
    %58 = arith.cmpi ne, %57, %c0_i32_22 : i32
    scf.if %58 {
      %c0_23 = arith.constant 0 : index
      %c0_24 = arith.constant 0 : index
      %59 = vector.load %arg7[%c0_23, %c0_24] : memref<8x384xf32, #tpu.memory_space<vmem>>, vector<8x384xf32>
      %c0_25 = arith.constant 0 : index
      %c0_26 = arith.constant 0 : index
      %c0_27 = arith.constant 0 : index
      %60 = vector.load %arg6[%c0_25, %c0_26, %c0_27] : memref<1x8x384xf32, #tpu.memory_space<vmem>>, vector<1x8x384xf32>
      %61 = vector.shape_cast %60 : vector<1x8x384xf32> to vector<8x384xf32>
      %62 = vector.shape_cast %59 : vector<8x384xf32> to vector<1x8x384xf32>
      tpu.vector_store %arg6[%c0_25, %c0_26, %c0_27], %62 {strides = array<i32>} : memref<1x8x384xf32, #tpu.memory_space<vmem>>, vector<1x8x384xf32>,
    } else {
    }
    return
  }
  func.func @transform_0(%arg0: i32, %arg1: i32, %arg2: i32) -> (i32, i32, i32, i32) {
    %c0_i32 = arith.constant 0 : i32
    %c0_i32_0 = arith.constant 0 : i32
    return %arg0, %arg1, %c0_i32, %arg2 : i32, i32, i32, i32
  }
  func.func @transform_1(%arg0: i32, %arg1: i32, %arg2: i32) -> (i32, i32, i32) {
    %c0_i32 = arith.constant 0 : i32
    %c0_i32_0 = arith.constant 0 : i32
    %c0_i32_1 = arith.constant 0 : i32
    return %arg0, %c0_i32, %c0_i32_0 : i32, i32, i32
  }
  func.func @transform_2(%arg0: i32, %arg1: i32, %arg2: i32) -> (i32, i32) {
    %c0_i32 = arith.constant 0 : i32
    %c0_i32_0 = arith.constant 0 : i32
    %c0_i32_1 = arith.constant 0 : i32
    return %c0_i32, %c0_i32_0 : i32, i32
  }
  func.func @transform_3(%arg0: i32, %arg1: i32, %arg2: i32) -> (i32, i32, i32) {
    %c0_i32 = arith.constant 0 : i32
    %c0_i32_0 = arith.constant 0 : i32
    %c0_i32_1 = arith.constant 0 : i32
    return %arg0, %c0_i32, %c0_i32_0 : i32, i32, i32
  }
}

</mosaic_0001>

<bundles_post_ra>
// kernel: tpu_custom_call.1
= control target key start
LH: loop header
LB: loop body
LE: loop exit
PB: predicated region body
PF: predicated region fallthrough
CT: control target
= control target key end

     0   :  { %s2284_s0 = inlined_call_operand.hbm [shape: s32[2,7,1,256], index: 0, kind: input, shape index: {}]   ;;  %s2285_s1 = inlined_call_operand.hbm [shape: f32[2,4,256], index: 1, kind: input, shape index: {}]   ;;  %s2286_s2 = inlined_call_operand.hbm [shape: f32[8,5], index: 2, kind: input, shape index: {}]   ;;  %s2287_s3 = inlined_call_operand.hbm [shape: f32[2,8,384], index: 3, kind: output, shape index: {}]  }
   0x1   :  { %2304 = sst [smem:[#allocation24_spill]] %s2286_s2 }
   0x2   :  { %2305 = sst [smem:[#allocation25_spill]] %s2287_s3 }
   0x3   :  { %8 = vsyncpa [#allocation4], 0 }
   0x4   :  { %10 = vsyncpa [#allocation4 + $0x1], 0 }
   0x5   :  { %11 = vsyncpa [#allocation7], 0 }
   0x6   :  { %13 = vsyncpa [#allocation7 + $0x1], 0 }
   0x7   :  { %14 = vsyncpa [#allocation5], 0 }
   0x8   :  { %16 = vsyncpa [#allocation5 + $0x1], 0  ;;  %s1626_s12 = smov 0   ;;  %s1628_s13 = smov 0  }
   0x9   :  { %s1630_s14 = smov 0   ;;  %s1632_s15 = smov 0  }
   0xa   :  { %s1634_s16 = smov 0   ;;  %s1636_s17 = smov 0  }
   0xb   :  { %s1638_s18 = smov 0   ;;  %s1640_s19 = smov 0  }
   0xc   :  { %s1642_s20 = smov 0   ;;  %s1644_s21 = smov 0  }
   0xd   :  { %s1646_s22 = smov 0   ;;  %s1648_s23 = smov 0  }
   0xe   :  { %s1650_s24 = smov 0  }
   0xf LB: > { %2306 = sst [smem:[#allocation14_spill]] %s1547_s12  ;;  %s1690_s25 = sadd.s32 4294967295, %s1595_s24   ;;  %s1595_s24 = sphi %s1650_s24, %s22_s24   ;;  %s1591_s23 = sphi %s1648_s23, %s2392_s23   ;;  %s1587_s22 = sphi %s1646_s22, %s2391_s22   ;;  %s1583_s21 = sphi %s1644_s21, %s2390_s21   ;;  %s1579_s20 = sphi %s1642_s20, %s2389_s20   ;;  %s1575_s19 = sphi %s1640_s19, %s2379_s19   ;;  %s1571_s18 = sphi %s1638_s18, %s2378_s18   ;;  %s1567_s17 = sphi %s1636_s17, %s2388_s17   ;;  %s1563_s16 = sphi %s1634_s16, %s2387_s16   ;;  %s1559_s15 = sphi %s1632_s15, %s2386_s15   ;;  %s1555_s14 = sphi %s1630_s14, %s2385_s14   ;;  %s1551_s13 = sphi %s1628_s13, %s2384_s13   ;;  %s1547_s12 = sphi %s1626_s12, %s2383_s12  }
  0x10   : > { %2307 = sst [smem:[#allocation15_spill]] %s1571_s18  ;;  %s942_s26 = sadd.s32 4294967294, %s1595_s24  }
  0x11   : > { %2308 = sst [smem:[#allocation16_spill]] %s1575_s19  ;;  %p65_p0 = scmp.ne.s32.totalorder %s1563_s16, %s1559_s15 }
  0x12   : > { %2309 = sst [smem:[#allocation17_spill]] %s1579_s20  ;;  %p2298_p1 = scmp.eq.s32.totalorder %s1690_s25, 0 }
  0x13   : > { %2310 = sst [smem:[#allocation18_spill]] %s1583_s21  ;;  %p91_p2 = scmp.ne.s32.totalorder %s1551_s13, %s1547_s12 }
  0x14   : > { %2311 = sst [smem:[#allocation19_spill]] %s1587_s22  ;;  %p1700_p4 = por %p2298_p1, %p65_p0 }
  0x15   : > { %p142_p5 = scmp.eq.s32.totalorder %s942_s26, 27  ;;  %p1706_p6 = por %p91_p2, %p2298_p1 }
  0x16   : > { %p943_p7 = scmp.ge.s32.totalorder %s1595_s24, 1  ;;  %p149_p9 = scmp.lt.s32.totalorder %s1595_s24, 29 }
  0x17   : > { %s2313_s28 = scalar_select %p1706_p6, 1, 0 }
  0x18   : > { %p1711_p8 = por %p142_p5, %p91_p2  ;;  %p1716_p10 = pnand %p943_p7, %p149_p9 }
  0x19   : > { %s1597_s4 = smov [#allocation8]  }
  0x1a   : > { %s2314_s29 = scalar_select %p1711_p8, 1, 0 }
  0x1b   : > { %s162_s5 = sshll.u32 %s1597_s4, 4  ;;  %p1234_p11 = pneg %p1716_p10  ;;  %s163_s5 = int_to_ptr.vmem [resolvable:$true] %s162_s5 }
  0x1c   : > { %2315 = sst [smem:[#allocation20_spill]] %s2314_s29  ;;  %s1380_s6 = scalar_lea.vmem %s163_s5, 128 }
  0x1d   : > { %p1235_p12 = pnand %p1234_p11, %p2298_p1  ;;  %p1381_p0 = scmp.ne.s32.totalorder %s163_s5, %s1380_s6 }
  0x1e   : > { %p1388_p3 = scmp.lt.s32.totalorder %s163_s5, %s163_s5  ;;  %p1389_p8 = scmp.lt.s32.totalorder %s1380_s6, %s1380_s6 }
  0x1f   : > { %p1371_p13 = pneg %p1235_p12 }
  0x20   : > { %p1390_p6 = por %p1389_p8, %p1388_p3 }
  0x21   : > { %p1383_p2 = pnand %p1381_p0, %p1371_p13 }
  0x23   : > { %p1384_p5 = pneg %p1383_p2 }
  0x25   : > { %p1391_p7 = pnand %p1390_p6, %p1384_p5 }
  0x27   : > { %1394 = shalt.err (!%p1391_p7)
}
  0x28   : > { %s2317_s2 = sld [smem:[#allocation24_spill]]  ;;  %s34_s9 = sadd.s32 1, %s1583_s21 }
  0x29   : > { %p35_p3 = scmp.ge.s32.totalorder %s34_s9, 2  ;;  %s37_s10 = sadd.s32 1, %s1587_s22 }
  0x2a   : > { %s41_s11 = sadd.s32 1, %s1591_s23  ;;  %p59_p6 = scmp.ne.s32.totalorder %s1567_s17, %s1563_s16 }
  0x2b   : > { %s2394_s9 = smov (%p35_p3, %s34_s9), 0  ;;  %s2396_s10 = smov (!%p35_p3, %s37_s10), %s1587_s22 }
  0x2c   : > { %2318 = sst [smem:[#allocation21_spill]] %s2394_s9  ;;  %s48_s26 = ssub.s32 %s1583_s21, %s2394_s9 }
  0x2d   : > { %p39_p8 = scmp.ge.s32.totalorder %s2396_s10, 7  ;;  %p60_p9 = scmp.eq.s32.totalorder %s1595_s24, 0 }
  0x2e   : > { %1237 = dma.hbm_to_vmem [thread:$0]  (!%p1235_p12), %s2317_s2, 128, %s163_s5, [#allocation7]  }
  0x2f   : > { %p1250_p11 = scmp.lt.s32.totalorder %s1595_s24, 28  ;;  %s173_s4 = sand.u32 1, %s1567_s17  }
  0x30   : > { %s2398_s10 = smov (%p39_p8, %s2396_s10), 0  ;;  %s2400_s11 = smov (!%p39_p8, %s41_s11), %s1591_s23 }
  0x31   : > { %2319 = sst [smem:[#allocation22_spill]] %s2398_s10  ;;  %s46_s5 = ssub.s32 %s1587_s22, %s2398_s10 }
  0x32   : > { %p1748_p12 = por %p60_p9, %p59_p6  ;;  %p43_p13 = scmp.ge.s32.totalorder %s2400_s11, 2 }
  0x33   : > { %s946_s7 = sshll.u32 %s1587_s22, 1  ;;  %s1221_s15 = smul.u32 14, %s1591_s23 }
  0x34   : > { %s2402_s11 = smov (%p43_p13, %s2400_s11), 0  ;;  %s181_s8 = sadd.s32 %s1583_s21, %s946_s7 }
  0x35   : > { %2321 = sst [smem:[#allocation23_spill]] %s2402_s11  ;;  %s1759_s2 = ssub.s32 %s1591_s23, %s2402_s11 }
  0x36   : > { %s176_s10 = scalar_lea.vmem [#allocation3], %s173_s4  ;;  %s47_s29 = sor.u32 %s46_s5, %s1759_s2 }
  0x37   : > { %s187_s9 = sshll.u32 %s176_s10, 4  ;;  %p76_p0 = scmp.eq.s32.totalorder %s1759_s2, 0  ;;  %s188_s9 = int_to_ptr.vmem [resolvable:$true] %s187_s9 }
  0x38   : > { %s49_s12 = sor.u32 %s48_s26, %s47_s29  ;;  %s183_s3 = sadd.s32 %s1221_s15, %s181_s8 }
  0x39   : > { %p50_p2 = scmp.eq.s32.totalorder %s49_s12, 0  ;;  %s947_s22 = sshll.u32 %s183_s3, 4 }
  0x3a   : > { %s185_s19 = scalar_lea.hbm %s2284_s0, %s947_s22  ;;  %s2322_s7 = sadd.s32 1, %s1567_s17 }
  0x3b   : > { %s1769_s21 = scalar_select %p50_p2, %s1567_s17, %s2322_s7  }
  0x3c   : > { %p1775_p5 = pnand %p1250_p11, %p1748_p12  ;;  %s194_s10 = sand.u32 1, %s1595_s24  }
  0x3d   : > { %s78_s29 = sadd.s32 1, %s1555_s14  ;;  %s174_s15 = scalar_lea.sflag [#allocation4], %s173_s4 }
  0x3e   : > { %p1397_p7 = pneg %p1775_p5  ;;  %s1408_s3 = scalar_lea.vmem %s188_s9, 16 }
  0x3f   : > { %p1409_p3 = scmp.ne.s32.totalorder %s188_s9, %s1408_s3  ;;  %s1598_s12 = smov [#allocation3]  }
  0x40   : > { %s1413_s18 = sshll.u32 %s1598_s12, 4  ;;  %s1414_s18 = int_to_ptr.vmem [resolvable:$false] %s1413_s18 }
  0x41   : > { %p1411_p6 = pnand %p1409_p3, %p1397_p7  ;;  %s1415_s20 = scalar_lea.vmem %s1414_s18, 32 }
  0x42   : > { %p1416_p13 = scmp.lt.s32.totalorder %s188_s9, %s1414_s18  ;;  %p1417_p2 = scmp.lt.s32.totalorder %s1415_s20, %s1408_s3 }
  0x43   : > { %p1412_p8 = pneg %p1411_p6 }
  0x44   : > { %p1418_p12 = por %p1417_p2, %p1416_p13 }
  0x46   : > { %p1419_p1 = pnand %p1418_p12, %p1412_p8 }
  0x48   : > { %1422 = shalt.err (!%p1419_p1)
}
  0x49   : > { %1241 = dma.hbm_to_vmem [thread:$0]  (!%p1775_p5), %s185_s19, 16, %s188_s9, %s174_s15  }
  0x4a   : > { %s1788_s22 = scalar_select %p76_p0, %s1555_s14, %s78_s29  }
  0x4b   : > { %p85_p7 = scmp.ne.s32.totalorder %s1555_s14, %s1551_s13  ;;  %s196_s26 = sand.u32 1, %s1555_s14  }
  0x4c   : > { %s1122_s4 = sshll.u32 %s1591_s23, 7  ;;  %p2324_p3 = scmp.eq.s32.totalorder %s1690_s25, 27 }
  0x4d   : > { %p87_p1 = por %p85_p7, %p60_p9  ;;  %s948_s5 = sshll.u32 %s196_s26, 3 }
  0x4e   : > { %p1798_p6 = por %p2324_p3, %p85_p7  ;;  %s204_s7 = scalar_lea.hbm %s2285_s1, %s1122_s4 }
  0x4f   : > { %p1807_p5 = pnand %p1250_p11, %p87_p1  ;;  %s198_s19 = scalar_lea.vmem [#allocation6], %s948_s5 }
  0x50   : > { %s206_s9 = sshll.u32 %s198_s19, 4  ;;  %s195_s29 = scalar_lea.sflag [#allocation7], %s194_s10  ;;  %s207_s9 = int_to_ptr.vmem [resolvable:$true] %s206_s9 }
  0x51   : > { %p1425_p9 = pneg %p1807_p5  ;;  %s1436_s15 = scalar_lea.vmem %s207_s9, 128 }
  0x52   : > { %p1437_p0 = scmp.ne.s32.totalorder %s207_s9, %s1436_s15  ;;  %s1599_s3 = smov [#allocation6]  }
  0x53   : > { %s1441_s12 = sshll.u32 %s1599_s3, 4  ;;  %s1442_s12 = int_to_ptr.vmem [resolvable:$false] %s1441_s12 }
  0x54   : > { %p1439_p8 = pnand %p1437_p0, %p1425_p9  ;;  %s1443_s18 = scalar_lea.vmem %s1442_s12, 256 }
  0x55   : > { %p1444_p11 = scmp.lt.s32.totalorder %s207_s9, %s1442_s12  ;;  %p1445_p2 = scmp.lt.s32.totalorder %s1443_s18, %s1436_s15 }
  0x56   : > { %p1440_p13 = pneg %p1439_p8 }
  0x57   : > { %p1446_p12 = por %p1445_p2, %p1444_p11 }
  0x59   : > { %p1447_p7 = pnand %p1446_p12, %p1440_p13 }
  0x5b   : > { %1450 = shalt.err (!%p1447_p7)
}
  0x5c   : > { %1244 = dma.hbm_to_vmem [thread:$0]  (!%p1807_p5), %s204_s7, 128, %s207_s9, %s195_s29  }
  0x5d   : > { %215 = sbr.rel (%p1716_p10) target bundleno = 830 (0x33e), region = 32  ;;  %s217_s10 = sand.u32 (!%p1716_p10), 1, %s1563_s16  }
  0x5e   : > { %s218_s20 = scalar_lea.sflag (!%p1716_p10), [#allocation4], %s217_s10  ;;  %s1820_s26 = scalar_lea.vmem (!%p1716_p10), [#allocation3], %s217_s10 }
  0x62   : > { %1530 = dma.done.wait (%p1700_p4), %s218_s20, 16  }
  0x63   : > { %1532 = vsyncadd (%p1700_p4), %s218_s20, 4294967280  ;;  %s225_s4 = sand.u32 1, %s1690_s25   ;;  %s1828_s5 = sand.u32 1, %s1551_s13  }
  0x64   : > { %s952_s30 = sshll.u32 %s1828_s5, 3  ;;  %s226_s6 = scalar_lea.sflag [#allocation7], %s225_s4 }
  0x65   : > { %s1831_s8 = scalar_lea.vmem [#allocation6], %s952_s30  ;;  %p2327_p10 = scmp.ne.s32.totalorder %s2313_s28, 0 }
  0x67   : > { %1534 = dma.done.wait (%p2327_p10), %s226_s6, 128  }
  0x68   : > { %1536 = vsyncadd (%p2327_p10), %s226_s6, 4294967168  ;;  %p2328_p1 = scmp.eq.s32.totalorder %s1690_s25, 0 }
  0x6a   : > { %1538 = dma.done.wait (%p2328_p1), [#allocation7], 128   ;;  %p2329_p4 = pmov %p2328_p1 }
  0x6b   : > { %s2330_s27 = sld [smem:[#allocation16_spill]]  ;;  %s1222_s2 = smul.u32 24, %s1828_s5 }
  0x6c   : > { %1540 = vsyncadd (%p2329_p4), [#allocation7], 4294967168  ;;  %s2331_s7 = sld [smem:[#allocation15_spill]] }
  0x6d   : > { %s1844_s19 = scalar_lea.vmem [#allocation9], %s1222_s2 }
  0x71   : > { %p261_p3 = scmp.eq.s32.totalorder %s2330_s27, 0 }
  0x72   : > { %p262_p5 = scmp.eq.s32.totalorder %s2331_s7, 0 }
  0x74   : > { %p263_p9 = pnand %p262_p5, %p261_p3 }
  0x76   : > { %266 = sbr.rel (%p263_p9) target bundleno = 126 (0x7e), region = 48 }
  0x7b   : > { %v1600_v0 = vmov 0.0  }
  0x7c   : > { %267 = vst [vmem:[#allocation2 + $0x10] sm:$0xff] %v1600_v0  ;;  %268 = vst [vmem:[#allocation2] sm:$0xff] %v1600_v0 }
  0x7d   : > { %269 = vst [vmem:[#allocation2 + $0x8] sm:$0xff] %v1600_v0 }
  0x7e PF: > { %v272_v1 = vlaneseq  ;;  %v1847_v2 = vld [vmem:[%s1831_s8] sm:$0xff]  ;;  %v1601_v4 = vmov 4   ;;  %v1851_v5 = vld [vmem:[#allocation8] sm:$0xff]  ;;  %v1602_v18 = vmov 1.0|1.0   ;;  %v2344_v36 = vmov 0 }
  0x7f   : > { %v495_v3 = vcombine.high %v1847_v2, %v1847_v2  ;;  %1363 = vset.pattern.permute.xlu0 %v1601_v4  ;;  %v1857_v7 = vld [vmem:[%s1820_s26] ss:$0 sm:$0xff]  ;;  %v1926_v28 = vpack.c.bf16 %v1847_v2, %v1847_v2  ;;  %v2346_v41 = vmov 0  ;;  %v2348_v44 = vmov 0  ;;  %s2364_s25 = sld [smem:[#allocation15_spill]] }
  0x80   : > { %v1853_v6 = vshrl.u32 %v272_v1, 7  ;;  %621 = vperm.xlu0 %1363, %v1851_v5   ;;  %v2350_v49 = vmov 0  ;;  %v2352_v51 = vmov 0  ;;  %v1603_v1 = vmov 0.0   ;;  %s2370_s3 = sld [smem:[#allocation16_spill]] }
  0x81   : > { %v1859_v8 = vpack.c.bf16 %v495_v3, %v495_v3  ;;  %v499_v35 = vunpack.c.l.bf16 %v1926_v28 }
  0x82   : > { %v303_v9 = vadd.s32 240, %v1853_v6  ;;  %v304_v10 = vadd.s32 248, %v1853_v6  ;;  %v287_v11 = vadd.s32 112, %v1853_v6  ;;  %v288_v12 = vadd.s32 120, %v1853_v6 }
  0x83   : > { %v301_v13 = vadd.s32 224, %v1853_v6  ;;  %v302_v14 = vadd.s32 232, %v1853_v6  ;;  %v285_v15 = vadd.s32 96, %v1853_v6  ;;  %v286_v16 = vadd.s32 104, %v1853_v6  ;;  %583 = vmatprep.mubr.bf16.mxu1 %v1859_v8 }
  0x84   : > { %vm355_vm0 = vcmp.eq.s32.totalorder %v303_v9, %v1857_v7  ;;  %vm356_vm1 = vcmp.eq.s32.totalorder %v304_v10, %v1857_v7  ;;  %vm339_vm2 = vcmp.eq.s32.totalorder %v287_v11, %v1857_v7  ;;  %vm340_vm3 = vcmp.eq.s32.totalorder %v288_v12, %v1857_v7 }
  0x85   : > { %vm1874_vm4 = vmpackc.low %vm356_vm1, %vm355_vm0  ;;  %vm353_vm5 = vcmp.eq.s32.totalorder %v301_v13, %v1857_v7  ;;  %vm354_vm6 = vcmp.eq.s32.totalorder %v302_v14, %v1857_v7  ;;  %vm337_vm7 = vcmp.eq.s32.totalorder %v285_v15, %v1857_v7  ;;  %vm338_vm8 = vcmp.eq.s32.totalorder %v286_v16, %v1857_v7  ;;  %s1067_s28 = sshll.u32 %s2364_s25, 7  ;;  %p793_p8 = scmp.eq.s32.totalorder %s2364_s25, 1 }
  0x86   : > { %1123 = vmatprep.subr.msk.bf16.mxu0 %vm1874_vm4, %v1602_v18  ;;  %1145 = vmatprep.subr.msk.bf16.mxu1 %vm1874_vm4, %v1602_v18  ;;  %vm1888_vm9 = vmpackc.low %vm340_vm3, %vm339_vm2  ;;  %v299_v20 = vadd.s32 208, %v1853_v6  ;;  %v300_v21 = vadd.s32 216, %v1853_v6  ;;  %v283_v22 = vadd.s32 80, %v1853_v6  ;;  %v284_v23 = vadd.s32 88, %v1853_v6  ;;  %s592_s9 = sshra.s32 %s1067_s28, 7  ;;  %p792_p0 = scmp.eq.s32.totalorder %s2370_s3, 6 }
  0x87   : > { %1124 = vmatpush3.bf16.msk.msra.mxu0 %vm1888_vm9, %v1602_v18  ;;  %1146 = vmatpush3.bf16.msk.msra.mxu1 %vm1888_vm9, %v1602_v18  ;;  %vm1902_vm10 = vmpackc.low %vm354_vm6, %vm353_vm5  ;;  %v297_v25 = vadd.s32 192, %v1853_v6  ;;  %v298_v26 = vadd.s32 200, %v1853_v6  ;;  %v281_v30 = vadd.s32 64, %v1853_v6  ;;  %v282_v31 = vadd.s32 72, %v1853_v6  ;;  %s1068_s29 = sshll.u32 %s592_s9, 2 }
  0x88   : > { %1125 = vmatprep.subr.msk.bf16.mxu0 %vm1902_vm10, %v1602_v18  ;;  %1147 = vmatprep.subr.msk.bf16.mxu1 %vm1902_vm10, %v1602_v18  ;;  %vm1918_vm11 = vmpackc.low %vm338_vm8, %vm337_vm7  ;;  %vm351_vm12 = vcmp.eq.s32.totalorder %v299_v20, %v1857_v7  ;;  %vm352_vm13 = vcmp.eq.s32.totalorder %v300_v21, %v1857_v7  ;;  %vm335_vm15 = vcmp.eq.s32.totalorder %v283_v22, %v1857_v7  ;;  %v295_v32 = vadd.s32 176, %v1853_v6  ;;  %s595_s15 = scalar_lea.vmem %s1831_s8, %s1068_s29 [#allocation6]  ;;  %p2208_p13 = pnand %p793_p8, %p792_p0 }
  0x89   : > { %vm1928_vm14 = vmpackc.low %vm352_vm13, %vm351_vm12  ;;  %vm336_vm0 = vcmp.eq.s32.totalorder %v284_v23, %v1857_v7  ;;  %vm349_vm1 = vcmp.eq.s32.totalorder %v297_v25, %v1857_v7  ;;  %vm350_vm2 = vcmp.eq.s32.totalorder %v298_v26, %v1857_v7  ;;  %v296_v33 = vadd.s32 184, %v1853_v6  ;;  %v596_v11 = vld [vmem:[%s595_s15] sm:$0xf] }
  0x8a   : > { %vm1952_vm3 = vmpackc.low %vm336_vm0, %vm335_vm15  ;;  %vm333_vm6 = vcmp.eq.s32.totalorder %v281_v30, %v1857_v7  ;;  %vm334_vm7 = vcmp.eq.s32.totalorder %v282_v31, %v1857_v7  ;;  %v279_v37 = vadd.s32 48, %v1853_v6  ;;  %v280_v38 = vadd.s32 56, %v1853_v6 }
  0x8b   : > { %1126 = vmatpush3.bf16.msk.msra.mxu0 %vm1918_vm11, %v1602_v18  ;;  %1148 = vmatpush3.bf16.msk.msra.mxu1 %vm1918_vm11, %v1602_v18  ;;  %vm1957_vm5 = vmpackc.low %vm350_vm2, %vm349_vm1  ;;  %vm347_vm8 = vcmp.eq.s32.totalorder %v295_v32, %v1857_v7  ;;  %vm348_vm12 = vcmp.eq.s32.totalorder %v296_v33, %v1857_v7  ;;  %v293_v39 = vadd.s32 160, %v1853_v6  ;;  %v294_v40 = vadd.s32 168, %v1853_v6 }
  0x8c   : > { %1127 = vmatprep.subr.msk.bf16.mxu0 %vm1928_vm14, %v1602_v18  ;;  %1149 = vmatprep.subr.msk.bf16.mxu1 %vm1928_vm14, %v1602_v18  ;;  %v2345_v36 = vsel %vm1957_vm5, 4294967295, %v2344_v36  ;;  %vm1981_vm13 = vmpackc.low %vm334_vm7, %vm333_vm6  ;;  %v277_v42 = vadd.s32 32, %v1853_v6  ;;  %v500_v43 = vunpack.c.l.bf16 %v1859_v8  ;;  %vm331_vm0 = vcmp.eq.s32.totalorder %v279_v37, %v1857_v7 }
  0x8d   : > { %v2347_v41 = vsel %vm1981_vm13, 4294967295, %v2346_v41  ;;  %vm1987_vm15 = vmpackc.low %vm348_vm12, %vm347_vm8  ;;  %vm332_vm1 = vcmp.eq.s32.totalorder %v280_v38, %v1857_v7  ;;  %v278_v45 = vadd.s32 40, %v1853_v6  ;;  %v291_v46 = vadd.s32 144, %v1853_v6 }
  0x8e   : > { %v2349_v44 = vsel %vm1987_vm15, 4294967295, %v2348_v44  ;;  %vm345_vm2 = vcmp.eq.s32.totalorder %v293_v39, %v1857_v7  ;;  %vm346_vm6 = vcmp.eq.s32.totalorder %v294_v40, %v1857_v7  ;;  %v292_v47 = vadd.s32 152, %v1853_v6  ;;  %vm2010_vm7 = vmpackc.low %vm332_vm1, %vm331_vm0 }
  0x8f   : > { %1128 = vmatpush3.bf16.msk.msra.mxu0 %vm1952_vm3, %v1602_v18  ;;  %1150 = vmatpush3.bf16.msk.msra.mxu1 %vm1952_vm3, %v1602_v18  ;;  %v503_v48 = vcombine.low %v499_v35, %v500_v43  ;;  %v2351_v49 = vsel %vm2010_vm7, 4294967295, %v2350_v49  ;;  %vm329_vm8 = vcmp.eq.s32.totalorder %v277_v42, %v1857_v7  ;;  %vm2016_vm12 = vmpackc.low %vm346_vm6, %vm345_vm2  ;;  %v275_v52 = vadd.s32 16, %v1853_v6 }
  0x90   : > { %1129 = vmatprep.subr.msk.bf16.mxu0 %vm1957_vm5, %v1602_v18  ;;  %1151 = vmatprep.subr.msk.bf16.mxu1 %vm1957_vm5, %v1602_v18  ;;  %v2353_v51 = vsel %vm2016_vm12, 4294967295, %v2352_v51  ;;  %vm343_vm5 = vcmp.eq.s32.totalorder %v291_v46, %v1857_v7  ;;  %v276_v53 = vadd.s32 24, %v1853_v6  ;;  %vm344_vm0 = vcmp.eq.s32.totalorder %v292_v47, %v1857_v7 }
  0x91   : > { %v505_v50 = vsub.f32 %v1847_v2, %v503_v48  ;;  %v289_v54 = vadd.s32 128, %v1853_v6  ;;  %v290_v55 = vadd.s32 136, %v1853_v6  ;;  %vm2045_vm2 = vmpackc.low %vm344_vm0, %vm343_vm5  ;;  %vm327_vm6 = vcmp.eq.s32.totalorder %v275_v52, %v1857_v7 }
  0x92   : > { %v274_v60 = vadd.s32 8, %v1853_v6  ;;  %v319_v29 = vadd.s32 368, %v1853_v6  ;;  %v320_v30 = vadd.s32 376, %v1853_v6  ;;  %v317_v39 = vadd.s32 352, %v1853_v6 }
  0x93   : > { %1130 = vmatpush3.bf16.msk.msra.mxu0 %vm1981_vm13, %v1602_v18  ;;  %1152 = vmatpush3.bf16.msk.msra.mxu1 %vm1981_vm13, %v1602_v18  ;;  %vm330_vm13 = vcmp.eq.s32.totalorder %v278_v45, %v1857_v7  ;;  %v507_v56 = vcombine.high %v505_v50, %v505_v50  ;;  %v509_v0 = vpack.c.bf16 %v505_v50, %v505_v50  ;;  %v318_v40 = vadd.s32 360, %v1853_v6 }
  0x94   : > { %1131 = vmatprep.subr.msk.bf16.mxu0 %vm1987_vm15, %v1602_v18  ;;  %1153 = vmatprep.subr.msk.bf16.mxu1 %vm1987_vm15, %v1602_v18  ;;  %vm2041_vm1 = vmpackc.low %vm330_vm13, %vm329_vm8  ;;  %vm341_vm15 = vcmp.eq.s32.totalorder %v289_v54, %v1857_v7  ;;  %vm325_vm8 = vcmp.eq.s32.totalorder %v1853_v6, %v1857_v7  ;;  %vm326_vm0 = vcmp.eq.s32.totalorder %v274_v60, %v1857_v7  ;;  %v316_v42 = vadd.s32 344, %v1853_v6  ;;  %v784_v60 = vld [vmem:[#allocation2] sm:$0xff] }
  0x95   : > { %v510_v58 = vpack.c.bf16 %v507_v56, %v507_v56  ;;  %v314_v43 = vadd.s32 328, %v1853_v6  ;;  %v312_v45 = vadd.s32 312, %v1853_v6  ;;  %v309_v46 = vadd.s32 288, %v1853_v6 }
  0x96   : > { %v310_v47 = vadd.s32 296, %v1853_v6  ;;  %v307_v48 = vadd.s32 272, %v1853_v6  ;;  %v305_v50 = vadd.s32 256, %v1853_v6 }
  0x97   : > { %1132 = vmatpush3.bf16.msk.msra.mxu0 %vm2010_vm7, %v1602_v18  ;;  %1154 = vmatpush3.bf16.msk.msra.mxu1 %vm2010_vm7, %v1602_v18  ;;  %vm328_vm7 = vcmp.eq.s32.totalorder %v276_v53, %v1857_v7 }
  0x98   : > { %1133 = vmatprep.subr.msk.bf16.mxu0 %vm2016_vm12, %v1602_v18  ;;  %1155 = vmatprep.subr.msk.bf16.mxu1 %vm2016_vm12, %v1602_v18  ;;  %vm342_vm12 = vcmp.eq.s32.totalorder %v290_v55, %v1857_v7  ;;  %vm2066_vm5 = vmpackc.low %vm328_vm7, %vm327_vm6  ;;  %vm599_vm7 = vcmask 1043456   ;;  %vm372_vm6 = vcmp.eq.s32.totalorder %v320_v30, %v1857_v7 }
  0x99   : > { %543 = vmatprep.mubr.bf16.mxu0 %v510_v58  ;;  %vm2070_vm13 = vmpackc.low %vm342_vm12, %vm341_vm15 }
  0x9a   : > { %vm2089_vm15 = vmpackc.low %vm326_vm0, %vm325_vm8  ;;  %vm369_vm8 = vcmp.eq.s32.totalorder %v317_v39, %v1857_v7  ;;  %vm370_vm0 = vcmp.eq.s32.totalorder %v318_v40, %v1857_v7 }
  0x9b   : > { %1134 = vmatpush3.bf16.msk.msra.mxu0 %vm2041_vm1, %v1602_v18  ;;  %1156 = vmatpush3.bf16.msk.msra.mxu1 %vm2041_vm1, %v1602_v18 }
  0x9c   : > { %1135 = vmatprep.subr.msk.bf16.mxu0 %vm2045_vm2, %v1602_v18  ;;  %1157 = vmatprep.subr.msk.bf16.mxu1 %vm2045_vm2, %v1602_v18 }
  0x9f   : > { %1136 = vmatpush3.bf16.msk.msra.mxu0 %vm2066_vm5, %v1602_v18  ;;  %1158 = vmatpush3.bf16.msk.msra.mxu1 %vm2066_vm5, %v1602_v18 }
  0xa0   : > { %1137 = vmatprep.subr.msk.bf16.mxu0 %vm2070_vm13, %v1602_v18  ;;  %1159 = vmatprep.subr.msk.bf16.mxu1 %vm2070_vm13, %v1602_v18 }
  0xa3   : > { %1138 = vmatpush3.bf16.msk.msra.mxu0 %vm2089_vm15, %v1602_v18  ;;  %1160 = vmatpush3.bf16.msk.msra.mxu1 %vm2089_vm15, %v1602_v18 }
  0xa4   : > { %1169 = vmatprep.subr.msk.bf16.mxu1 %vm1874_vm4, %v1602_v18  ;;  %vm2365_vm4 = vnez %v2345_v36  ;;  %1196 = vmatprep.subr.mxu0 %v1603_v1 }
  0xa6   : > { %544 = vmatmul.mubr.bf16.vlgmr.msra.gmra.mxu0 %v509_v0  ;;  %584 = vmatmul.mubr.bf16.vlgmr.msra.gmra.mxu1 %v1926_v28 }
  0xa7   : > { %1170 = vmatpush3.bf16.xpose.msk.msra.mxu1 %vm1888_vm9, %v1602_v18  ;;  %vm2366_vm9 = vnez %v2347_v41  ;;  %v315_v41 = vadd.s32 336, %v1853_v6 }
  0xa8   : > { %1171 = vmatprep.subr.msk.bf16.mxu1 %vm1902_vm10, %v1602_v18  ;;  %vm2367_vm10 = vnez %v2349_v44  ;;  %v311_v44 = vadd.s32 304, %v1853_v6 }
  0xaf   : > { %1172 = vmatpush3.bf16.xpose.msk.msra.mxu1 %vm1918_vm11, %v1602_v18  ;;  %vm2368_vm11 = vnez %v2351_v49  ;;  %v308_v49 = vadd.s32 280, %v1853_v6 }
  0xb0   : > { %1173 = vmatprep.subr.msk.bf16.mxu1 %vm1928_vm14, %v1602_v18  ;;  %vm2369_vm14 = vnez %v2353_v51  ;;  %v306_v51 = vadd.s32 264, %v1853_v6 }
  0xb7   : > { %1174 = vmatpush3.bf16.xpose.msk.msra.mxu1 %vm1952_vm3, %v1602_v18  ;;  %vm1604_vm3 = vmmov 0  }
  0xb8   : > { %1175 = vmatprep.subr.msk.bf16.mxu1 %vm2365_vm4, %v1602_v18  ;;  %1198 = vmatprep.mubr.msk.f32.mxu0 %vm1604_vm3, %v1603_v1  ;;  %vm367_vm4 = vcmp.eq.s32.totalorder %v315_v41, %v1857_v7 }
  0xbf   : > { %1176 = vmatpush3.bf16.xpose.msk.msra.mxu1 %vm2366_vm9, %v1602_v18  ;;  %vm368_vm9 = vcmp.eq.s32.totalorder %v316_v42, %v1857_v7 }
  0xc0   : > { %1177 = vmatprep.subr.msk.bf16.mxu1 %vm2367_vm10, %v1602_v18  ;;  %vm1107_vm10 = vmpackc.low %vm368_vm9, %vm367_vm4  ;;  %vm358_vm4 = vcmp.eq.s32.totalorder %v306_v51, %v1857_v7 }
  0xc7   : > { %1178 = vmatpush3.bf16.xpose.msk.msra.mxu1 %vm2368_vm11, %v1602_v18 }
  0xc8   : > { %1179 = vmatprep.subr.msk.bf16.mxu1 %vm2369_vm14, %v1602_v18  ;;  %vm366_vm14 = vcmp.eq.s32.totalorder %v314_v43, %v1857_v7 }
  0xcf   : > { %1180 = vmatpush3.bf16.xpose.msk.msra.mxu1 %vm2041_vm1, %v1602_v18 }
  0xd0   : > { %1181 = vmatprep.subr.msk.bf16.mxu1 %vm2045_vm2, %v1602_v18  ;;  %vm371_vm2 = vcmp.eq.s32.totalorder %v319_v29, %v1857_v7 }
  0xd7   : > { %1182 = vmatpush3.bf16.xpose.msk.msra.mxu1 %vm2066_vm5, %v1602_v18  ;;  %vm625_vm5 = vcmask 31744  }
  0xd8   : > { %1183 = vmatprep.subr.msk.bf16.mxu1 %vm2070_vm13, %v1602_v18  ;;  %vm1103_vm13 = vmpackc.low %vm372_vm6, %vm371_vm2  ;;  %vm361_vm2 = vcmp.eq.s32.totalorder %v309_v46, %v1857_v7  ;;  %vm362_vm6 = vcmp.eq.s32.totalorder %v310_v47, %v1857_v7 }
  0xdf   : > { %1184 = vmatpush3.bf16.xpose.msk.msra.mxu1 %vm2089_vm15, %v1602_v18  ;;  %vm1105_vm15 = vmpackc.low %vm370_vm0, %vm369_vm8  ;;  %vm360_vm8 = vcmp.eq.s32.totalorder %v308_v49, %v1857_v7 }
  0xfb   : > { %v622_v52 = vpop.permute.xlu0 %621 }
 0x166   : > { %v1139_v2 = vpop.f32.mrf.mxu0  ;;  %v1161_v3 = vpop.f32.mrf.mxu1 }
 0x168   : > { %v1140_v4 = vpop.f32.mrf.mxu0  ;;  %v1162_v8 = vpop.f32.mrf.mxu1 }
 0x169   : > { %v1141_v9 = vadd.f32 %v1140_v4, %v1139_v2  ;;  %v1163_v10 = vadd.f32 %v1162_v8, %v1161_v3 }
 0x16a   : > { %v1142_v12 = vpop.f32.mrf.mxu0  ;;  %v1164_v13 = vpop.f32.mrf.mxu1 }
 0x16b   : > { %v586_v14 = vadd.f32 %v1163_v10, %v1141_v9 }
 0x16c   : > { %v1143_v15 = vpop.f32.mrf.mxu0  ;;  %v1165_v16 = vpop.f32.mrf.mxu1 }
 0x16d   : > { %v597_v17 = vsub.f32 %v586_v14, %v596_v11 }
 0x16f   : > { %v598_v19 = vmul.f32 %v597_v17, %v597_v17 }
 0x171   : > { %v600_v20 = vsel %vm599_vm7, %v598_v19, 0.0 }
 0x172   : > { %v601_v21 = vrot.slane %v600_v20, 4 }
 0x174   : > { %v602_v22 = vadd.f32 %v601_v21, %v600_v20 }
 0x176   : > { %v603_v23 = vrot.slane %v602_v22, 2 }
 0x178   : > { %v604_v24 = vadd.f32 %v603_v23, %v602_v22 }
 0x17a   : > { %v605_v25 = vrot.slane %v604_v24, 1 }
 0x17c   : > { %v606_v26 = vadd.f32 %v605_v25, %v604_v24 }
 0x17e   : > { %v607_v27 = vmul.f32 2.0, %v606_v26  ;;  %1365 = vrsqrt.f32 %v606_v26  ;;  %vm613_vm12 = vcmp.eq.f32.partialorder %v606_v26, inf  ;;  %v616_v33 = vand.u32 2147483648, %v606_v26 }
 0x17f   : > { %vm615_vm1 = vcmp.eq.f32.partialorder %v606_v26, 0.0 }
 0x180   : > { %v608_v28 = vadd.f32 1e-12, %v607_v27 }
 0x182   : > { %1367 = vrsqrt.f32 %v608_v28 }
 0x18b   : > { %v1366_v31 = vpop.eup %1365 }
 0x18c   : > { %v612_v32 = vmul.f32 %v1366_v31, %v606_v26 }
 0x18e   : > { %v614_v34 = vsel %vm613_vm12, %v606_v26, %v612_v32  ;;  %vm364_vm12 = vcmp.eq.s32.totalorder %v312_v45, %v1857_v7 }
 0x18f   : > { %v1368_v35 = vpop.eup %1367  ;;  %v617_v36 = vsel %vm615_vm1, %v616_v33, %v614_v34 }
 0x190   : > { %v618_v37 = vmul.f32 %v1368_v35, %v617_v36  ;;  %v610_v38 = vmul.f32 %v1368_v35, %v597_v17 }
 0x192   : > { %1197 = vmatpush3.msk.msra.mxu0 %vm599_vm7, %v610_v38  ;;  %vm363_vm7 = vcmp.eq.s32.totalorder %v311_v44, %v1857_v7  ;;  %v624_v53 = vmul.f32 %v622_v52, %v618_v37 }
 0x193   : > { %1199 = vmatmul.mubr.msk.f32.vlgmr.msra.gmra.mxu0 %vm625_vm5, %v1851_v5  ;;  %1201 = vmatprep.subr.bf16.mxu0 %v1603_v1  ;;  %v313_v5 = vadd.s32 320, %v1853_v6  ;;  %vm1111_vm1 = vmpackc.low %vm364_vm12, %vm363_vm7  ;;  %v785_v6 = vld [vmem:[#allocation2 + $0x8] sm:$0xff] }
 0x194   : > { %1202 = vmatpush3.bf16.xpose.msk.msra.mxu0 %vm1103_vm13, %v1602_v18  ;;  %1217 = vmatprep.mubr.msk.bf16.mxu0 %vm1604_vm3, %v1603_v1  ;;  %vm1113_vm5 = vmpackc.low %vm362_vm6, %vm361_vm2  ;;  %vm359_vm13 = vcmp.eq.s32.totalorder %v307_v48, %v1857_v7 }
 0x195   : > { %1203 = vmatprep.subr.bf16.mxu0 %v1603_v1  ;;  %vm365_vm11 = vcmp.eq.s32.totalorder %v313_v5, %v1857_v7  ;;  %vm1115_vm0 = vmpackc.low %vm360_vm8, %vm359_vm13 }
 0x196   : > { %vm1109_vm3 = vmpackc.low %vm366_vm14, %vm365_vm11 }
 0x19c   : > { %1204 = vmatpush3.bf16.xpose.msk.msra.mxu0 %vm1105_vm15, %v1602_v18  ;;  %vm357_vm15 = vcmp.eq.s32.totalorder %v305_v50, %v1857_v7  ;;  %v783_v7 = vld [vmem:[#allocation2 + $0x10] sm:$0xff] }
 0x19d   : > { %1205 = vmatprep.subr.bf16.mxu0 %v1603_v1  ;;  %vm1117_vm9 = vmpackc.low %vm358_vm4, %vm357_vm15 }
 0x1a4   : > { %1206 = vmatpush3.bf16.xpose.msk.msra.mxu0 %vm1107_vm10, %v1602_v18 }
 0x1a5   : > { %1207 = vmatprep.subr.bf16.mxu0 %v1603_v1 }
 0x1ac   : > { %1208 = vmatpush3.bf16.xpose.msk.msra.mxu0 %vm1109_vm3, %v1602_v18 }
 0x1ad   : > { %1209 = vmatprep.subr.bf16.mxu0 %v1603_v1 }
 0x1b4   : > { %1210 = vmatpush3.bf16.xpose.msk.msra.mxu0 %vm1111_vm1, %v1602_v18 }
 0x1b5   : > { %1211 = vmatprep.subr.bf16.mxu0 %v1603_v1 }
 0x1bc   : > { %1212 = vmatpush3.bf16.xpose.msk.msra.mxu0 %vm1113_vm5, %v1602_v18 }
 0x1bd   : > { %1213 = vmatprep.subr.bf16.mxu0 %v1603_v1 }
 0x1c4   : > { %1214 = vmatpush3.bf16.xpose.msk.msra.mxu0 %vm1115_vm0, %v1602_v18 }
 0x1c5   : > { %1215 = vmatprep.subr.bf16.mxu0 %v1603_v1 }
 0x1cc   : > { %1216 = vmatpush3.bf16.xpose.msk.msra.mxu0 %vm1117_vm9, %v1602_v18 }
 0x253   : > { %v697_v54 = vpop.f32.mrf.mxu0 }
 0x254   : > { %v698_v55 = vadd.f32 %v697_v54, %v624_v53 }
 0x255   : > { %v1200_v56 = vpop.f32.mrf.mxu0 }
 0x256   : > { %v701_v57 = vpack.c.bf16 %v698_v55, %v698_v55 }
 0x258   : > { %1185 = vmatprep.mubr.bf16.mxu1 %v701_v57  ;;  %1218 = vmatmul.mubr.bf16.vlgmr.msra.gmra.mxu0 %v701_v57 }
 0x259   : > { %1186 = vmatmul.mubr.bf16.vlgmr.msra.gmra.mxu1 %v701_v57 }
 0x318   : > { %v777_v58 = vpop.f32.mrf.mxu0 }
 0x319   : > { %v788_v59 = vadd.f32 %v785_v6, %v777_v58  ;;  %v736_v18 = vpop.f32.mrf.mxu1 }
 0x31a   : > { %v786_v61 = vadd.f32 %v783_v7, %v736_v18  ;;  %v1219_v62 = vpop.f32.mrf.mxu0 }
 0x31b   : > { %791 = vst [vmem:[#allocation2 + $0x8] sm:$0xff] %v788_v59  ;;  %v738_v63 = vpop.f32.mrf.mxu1  ;;  %797 = sbr.rel (%p2208_p13) target bundleno = 807 (0x327), region = 52 }
 0x31c   : > { %789 = vst [vmem:[#allocation2 + $0x10] sm:$0xff] %v786_v61  ;;  %v787_v0 = vadd.f32 %v784_v60, %v738_v63  ;;  %v780_v1 = vpop.f32.mrf.mxu0 }
 0x31d   : > { %v740_v2 = vpop.f32.mrf.mxu1 }
 0x31e   : > { %790 = vst [vmem:[#allocation2] sm:$0xff] %v787_v0  ;;  %v1220_v3 = vpop.f32.mrf.mxu0 }
 0x31f   : > { %v741_v4 = vpop.f32.mrf.mxu1 }
 0x322   : > { %v800_v10 = vld [vmem:[#allocation2 + $0x8] sm:$0xff] }
 0x323   : > { %v798_v8 = vld [vmem:[#allocation2 + $0x10] sm:$0xff]  ;;  %803 = vst [vmem:[%s1844_s19 + $0x10] sm:$0xff] %v800_v10 }
 0x324   : > { %801 = vst [vmem:[%s1844_s19] sm:$0xff] %v798_v8 }
 0x325   : > { %v799_v9 = vld [vmem:[#allocation2] sm:$0xff] }
 0x326   : > { %802 = vst [vmem:[%s1844_s19 + $0x8] sm:$0xff] %v799_v9 }
 0x327 PF: > { %s2372_s18 = sld [smem:[#allocation17_spill]]  ;;  %s819_s20 = sshll.u32 %s1844_s19, 4  ;;  %s820_s20 = int_to_ptr.vmem [resolvable:$true] %s819_s20 }
 0x328   : > { %s2373_s30 = sld [smem:[#allocation25_spill]]  ;;  %s805_s8 = scalar_lea.sflag [#allocation5], %s1828_s5 }
 0x329   : > { %s1451_s27 = scalar_lea.vmem %s820_s20, 384  ;;  %s1605_s7 = smov [#allocation9]  }
 0x32a   : > { %p1452_p11 = scmp.ne.s32.totalorder %s820_s20, %s1451_s27  ;;  %s1455_s2 = sshll.u32 %s1605_s7, 4  ;;  %s1456_s2 = int_to_ptr.vmem [resolvable:$false] %s1455_s2 }
 0x32b   : > { %s1457_s25 = scalar_lea.vmem %s1456_s2, 768  ;;  %p1458_p7 = scmp.lt.s32.totalorder %s820_s20, %s1456_s2 }
 0x32c   : > { %p1453_p2 = pnand %p1452_p11, %p1798_p6  ;;  %p1459_p10 = scmp.lt.s32.totalorder %s1457_s25, %s1451_s27 }
 0x32d   : > { %s1223_s10 = smul.u32 384, %s2372_s18 }
 0x32e   : > { %p1454_p12 = pneg %p1453_p2  ;;  %p1460_p1 = por %p1459_p10, %p1458_p7 }
 0x32f   : > { %s817_s6 = scalar_lea.hbm %s2373_s30, %s1223_s10 }
 0x330   : > { %p1461_p4 = pnand %p1460_p1, %p1454_p12 }
 0x332   : > { %1464 = shalt.err (!%p1461_p4)
}
 0x333   : > { %s1465_s19 = scalar_lea.hbm %s817_s6, 384  ;;  %s1469_s9 = scalar_lea.hbm %s2373_s30, 768 }
 0x334   : > { %p1466_p3 = scmp.ne.s32.totalorder %s817_s6, %s1465_s19  ;;  %p1470_p0 = scmp.lt.s32.totalorder %s817_s6, %s2373_s30 }
 0x335   : > { %p1471_p8 = scmp.lt.s32.totalorder %s1469_s9, %s1465_s19 }
 0x336   : > { %p1467_p5 = pnand %p1466_p3, %p1798_p6 }
 0x337   : > { %p1472_p13 = por %p1471_p8, %p1470_p0 }
 0x338   : > { %p1468_p9 = pneg %p1467_p5 }
 0x33a   : > { %p1473_p11 = pnand %p1472_p13, %p1468_p9 }
 0x33c   : > { %1476 = shalt.err (!%p1473_p11)
}
 0x33d   : > { %1232 = dma.vmem_to_hbm [thread:$0]  (%p1798_p6), %s820_s20, 384, %s817_s6, %s805_s8  }
 0x33e PF: > { %s2374_s3 = sld [smem:[#allocation14_spill]]  ;;  %p1252_p2 = scmp.ge.s32.totalorder %s1595_s24, 2 }
 0x33f   : > { %s2375_s12 = sld [smem:[#allocation20_spill]] }
 0x344   : > { %s831_s18 = sand.u32 1, %s2374_s3  }
 0x345   : > { %p2376_p12 = scmp.ne.s32.totalorder %s2375_s12, 0  ;;  %s832_s10 = scalar_lea.sflag [#allocation5], %s831_s18 }
 0x347   : > { %p1246_p7 = pnand %p1252_p2, %p2376_p12 }
 0x349   : > { %p1247_p10 = pneg %p1246_p7 }
 0x34b   : > { %1542 = dma.done.wait (%p1247_p10), %s832_s10, 384  }
 0x34c   : > { %1544 = vsyncadd (%p1247_p10), %s832_s10, 4294966912  ;;  %s22_s24 = sadd.s32 1, %s1595_s24   ;;  %s2378_s18 = sld [smem:[#allocation18_spill]] }
 0x34d   : > { %p2240_p1 = scmp.ge.s32.totalorder %s22_s24, 30   ;;  %s2379_s19 = sld [smem:[#allocation19_spill]] }
 0x34e   : > { %s2380_s11 = sld [smem:[#allocation21_spill]]  ;;  %s2383_s12 = smov %s1551_s13 }
 0x34f   : > { %s2381_s4 = sld [smem:[#allocation22_spill]]  ;;  %s2384_s13 = smov %s1555_s14 }
 0x350   : > { %s2382_s6 = sld [smem:[#allocation23_spill]]  ;;  %s2385_s14 = smov %s1788_s22 }
 0x351   : > { %s2386_s15 = smov %s1563_s16  ;;  %s2387_s16 = smov %s1567_s17 }
 0x352   : > { %s2388_s17 = smov %s1769_s21  ;;  %s2389_s20 = smov %s1591_s23 }
 0x353   :  { %21 = sbr.rel (!%p2240_p1) target bundleno = 15 (0xf), region = 103 }
 0x354   : > { %s2390_s21 = smov %s2380_s11 }
 0x355   : > { %s2391_s22 = smov %s2381_s4 }
 0x356   : > { %s2392_s23 = smov %s2382_s6 }
 0x358   :  { %837 = vsyncpa [#allocation4], 1 }
 0x359   :  { %839 = vsyncpa [#allocation4 + $0x1], 1 }
 0x35a   :  { %840 = vsyncpa [#allocation7], 1 }
 0x35b   :  { %842 = vsyncpa [#allocation7 + $0x1], 1 }
 0x35c   :  { %843 = vsyncpa [#allocation5], 1 }
 0x35d   :  { %845 = vsyncpa [#allocation5 + $0x1], 1 }

</bundles_post_ra>
